<compile_context>
chip_gen: v7x
topology: tpu7x:2x2x1
jax: 0.10.0
libtpu: 0.0.40
codegen_flags: <defaults>
</compile_context>

<pallas_src>
import functools

import jax
import jax.numpy as jnp
from jax.experimental import pallas as pl
from jax.experimental.pallas import tpu as pltpu

F32 = jnp.float32


def _round_up(v, m):
    return (v + m - 1) // m * m


def _choose_row_tile(n, wo, s, budget_bytes=2 << 20):
    """Row tile over the fused (B*C*Ho) axis.

    Must be a multiple of 8 (sublane rule for a non-full block dim) or equal
    to the full extent n.  Sized so (s*s input taps + output) stays within a
    soft VMEM budget, leaving headroom for double buffering.
    """
    lane = _round_up(wo, 128)
    bytes_per_row = (s * s + 1) * lane * 4
    max_rows = max(1, budget_bytes // bytes_per_row)
    if n <= max_rows:
        return n                              # one block covers everything
    th = (max_rows // 8) * 8
    return max(8, min(th, n))


def _pooling_add_kernel(x_ref, o_ref, *, stride):
    """Fused max-pool + avg-pool over non-overlapping stride x stride windows.

    x_ref block: (s, s, TH, Wo)  -- window-tap axes leading, Wo on lanes
    o_ref block: (TH, Wo)

    The s*s taps are fully unrolled; each tap is a plain leading-int Ref load
    reduced on the VPU with maximum / add.  Result written once.
    """
    s = stride
    inv = 1.0 / float(s * s)
    mx = None
    sm = None
    for dy in range(s):
        for dx in range(s):
            v = x_ref[dy, dx]                 # (TH, Wo)
            if mx is None:
                mx, sm = v, v
            else:
                mx = jnp.maximum(mx, v)
                sm = sm + v
    o_ref[...] = mx + sm * inv


def pooling_add(x, stride):
    """PoolingAdd.forward for spatial_dims=2 (NCHW in, NCHW out).

    x: (B, C, H, W); returns (B, C, H // stride, W // stride) float32,
    equal to MaxPool2d(k=s, s)(x) + AvgPool2d(k=s, s)(x).
    """
    # TODO(synk): spatial_dims=3 (MaxPool3d/AvgPool3d) path not wired up; 2D only.
    s = int(stride)
    assert s >= 1
    b, c, h, w = x.shape
    ho, wo = h // s, w // s
    assert ho > 0 and wo > 0, "spatial dims must be >= stride"

    # PyTorch floor semantics: drop trailing rows/cols that don't fill a window.
    x = x[:, :, : ho * s, : wo * s].astype(F32)

    # Free row-major split of H -> (Ho, s) and W -> (Wo, s), then ONE XLA
    # transpose that hoists the two tap axes to the front.  Output needs no
    # transpose at all (plain reshape back to NCHW).
    x6 = x.reshape(b, c, ho, s, wo, s)
    xt = jnp.transpose(x6, (3, 5, 0, 1, 2, 4))           # (s, s, B, C, Ho, Wo)
    n = b * c * ho
    xt = xt.reshape(s, s, n, wo)

    th = _choose_row_tile(n, wo, s)
    grid = (pl.cdiv(n, th),)

    out_flat = pl.pallas_call(
        functools.partial(_pooling_add_kernel, stride=s),
        grid=grid,
        in_specs=[
            pl.BlockSpec((s, s, th, wo), lambda t: (0, 0, t, 0)),
        ],
        out_specs=pl.BlockSpec((th, wo), lambda t: (t, 0)),
        out_shape=jax.ShapeDtypeStruct((n, wo), F32),
        compiler_params=pltpu.CompilerParams(
            dimension_semantics=("parallel",)),
    )(xt)

    return out_flat.reshape(b, c, ho, wo)                # already NCHW


if __name__ == "__main__":
    key = jax.random.PRNGKey(0)
    x = jax.random.normal(key, (2, 4, 16, 16), dtype=jnp.float32)

    # --- stride=2 (as used inside LightMUNet's encoder down-sampling) --------
    fwd2 = jax.jit(functools.partial(pooling_add, stride=2))
    out = jax.block_until_ready(fwd2(x))
    assert out.shape == (2, 4, 8, 8), out.shape

    xs = x.reshape(2, 4, 8, 2, 8, 2)
    ref = jnp.max(xs, axis=(3, 5)) + jnp.mean(xs, axis=(3, 5))
    assert jnp.allclose(out, ref, rtol=1e-5, atol=1e-5), \
        float(jnp.max(jnp.abs(out - ref)))

    # --- non-divisible H exercises PyTorch floor (crop) semantics ------------
    x_odd = x[:, :, :15, :]
    out_odd = jax.block_until_ready(fwd2(x_odd))
    assert out_odd.shape == (2, 4, 7, 8), out_odd.shape
    xs2 = x_odd[:, :, :14, :].reshape(2, 4, 7, 2, 8, 2)
    ref2 = jnp.max(xs2, axis=(3, 5)) + jnp.mean(xs2, axis=(3, 5))
    assert jnp.allclose(out_odd, ref2, rtol=1e-5, atol=1e-5)

    # --- stride=1 (module default) degenerates to max+avg == 2*x -------------
    out1 = jax.block_until_ready(
        jax.jit(functools.partial(pooling_add, stride=1))(x))
    assert out1.shape == x.shape
    assert jnp.allclose(out1, 2.0 * x, rtol=1e-6, atol=1e-6)

    assert bool(jnp.all(jnp.isfinite(out)))
    print("KERNEL_OK")
</pallas_src>

<mosaic_0001>
module attributes {stable_mosaic.version = 11 : i64} {
  func.func @_pooling_add_kernel(%arg0: i32, %arg1: memref<2x2x64x8xf32, #tpu.memory_space<vmem>>, %arg2: memref<64x8xf32, #tpu.memory_space<vmem>>) attributes {dimension_semantics = [#tpu.dimension_semantics<parallel>], iteration_bounds = array<i64: 1>, scalar_prefetch = 0 : i64, scratch_operands = 0 : i64, tpu.core_type = #tpu.core_type<tc>, window_params = [{transform_indices = @transform_0, window_bounds = array<i64: 2, 2, 64, 8>}, {transform_indices = @transform_1, window_bounds = array<i64: 64, 8>}]} {
    %c0 = arith.constant 0 : index
    %c0_0 = arith.constant 0 : index
    %c0_1 = arith.constant 0 : index
    %c0_2 = arith.constant 0 : index
    %0 = vector.load %arg1[%c0, %c0_0, %c0_1, %c0_2] : memref<2x2x64x8xf32, #tpu.memory_space<vmem>>, vector<1x1x64x8xf32>
    %1 = vector.shape_cast %0 : vector<1x1x64x8xf32> to vector<64x8xf32>
    %c0_3 = arith.constant 0 : index
    %c1 = arith.constant 1 : index
    %c0_4 = arith.constant 0 : index
    %c0_5 = arith.constant 0 : index
    %2 = vector.load %arg1[%c0_3, %c1, %c0_4, %c0_5] : memref<2x2x64x8xf32, #tpu.memory_space<vmem>>, vector<1x1x64x8xf32>
    %3 = vector.shape_cast %2 : vector<1x1x64x8xf32> to vector<64x8xf32>
    %4 = arith.maximumf %1, %3 : vector<64x8xf32>
    %5 = arith.addf %1, %3 : vector<64x8xf32>
    %c1_6 = arith.constant 1 : index
    %c0_7 = arith.constant 0 : index
    %c0_8 = arith.constant 0 : index
    %c0_9 = arith.constant 0 : index
    %6 = vector.load %arg1[%c1_6, %c0_7, %c0_8, %c0_9] : memref<2x2x64x8xf32, #tpu.memory_space<vmem>>, vector<1x1x64x8xf32>
    %7 = vector.shape_cast %6 : vector<1x1x64x8xf32> to vector<64x8xf32>
    %8 = arith.maximumf %4, %7 : vector<64x8xf32>
    %9 = arith.addf %5, %7 : vector<64x8xf32>
    %c1_10 = arith.constant 1 : index
    %c1_11 = arith.constant 1 : index
    %c0_12 = arith.constant 0 : index
    %c0_13 = arith.constant 0 : index
    %10 = vector.load %arg1[%c1_10, %c1_11, %c0_12, %c0_13] : memref<2x2x64x8xf32, #tpu.memory_space<vmem>>, vector<1x1x64x8xf32>
    %11 = vector.shape_cast %10 : vector<1x1x64x8xf32> to vector<64x8xf32>
    %12 = arith.maximumf %8, %11 : vector<64x8xf32>
    %13 = arith.addf %9, %11 : vector<64x8xf32>
    %cst = arith.constant 2.500000e-01 : f32
    %14 = vector.broadcast %cst : f32 to vector<64x8xf32>
    %15 = arith.mulf %13, %14 : vector<64x8xf32>
    %16 = arith.addf %12, %15 : vector<64x8xf32>
    %c0_14 = arith.constant 0 : index
    %c0_15 = arith.constant 0 : index
    %17 = vector.load %arg2[%c0_14, %c0_15] : memref<64x8xf32, #tpu.memory_space<vmem>>, vector<64x8xf32>
    tpu.vector_store %arg2[%c0_14, %c0_15], %16 {strides = array<i32>} : memref<64x8xf32, #tpu.memory_space<vmem>>, vector<64x8xf32>,
    return
  }
  func.func @transform_0(%arg0: i32) -> (i32, i32, i32, i32) {
    %c0_i32 = arith.constant 0 : i32
    %c0_i32_0 = arith.constant 0 : i32
    %c0_i32_1 = arith.constant 0 : i32
    %c0_i32_2 = arith.constant 0 : i32
    return %c0_i32, %c0_i32_0, %arg0, %c0_i32_1 : i32, i32, i32, i32
  }
  func.func @transform_1(%arg0: i32) -> (i32, i32) {
    %c0_i32 = arith.constant 0 : i32
    %c0_i32_0 = arith.constant 0 : i32
    return %arg0, %c0_i32 : i32, i32
  }
}

</mosaic_0001>

<bundles_post_ra>
// kernel: pooling_add.1
= control target key start
LH: loop header
LB: loop body
LE: loop exit
PB: predicated region body
PF: predicated region fallthrough
CT: control target
= control target key end

     0   :  { %vm108_vm0 = vcmask 64512   ;;  %s313_s0 = inlined_call_operand.vmem [shape: f32[2,2,64,8], index: 0, kind: input, shape index: {}]   ;;  %s314_s1 = inlined_call_operand.hbm [shape: f32[64,8], index: 1, kind: output, shape index: {}]  }
   0x1   :  { %v9_v0 = vld [vmem:[%s313_s0] sm:$0xff]  ;;  %v10_v5 = vld [vmem:[%s313_s0 + $0x8] sm:$0xff]  ;;  %v11_v11 = vld [vmem:[%s313_s0 + $0x10] sm:$0xff] }
   0x2   :  { %v133_v1 = vld [vmem:[%s313_s0 + $0x40] sm:$0xff]  ;;  %v134_v6 = vld [vmem:[%s313_s0 + $0x48] sm:$0xff]  ;;  %v135_v15 = vld [vmem:[%s313_s0 + $0x50] sm:$0xff] }
   0x3   :  { %v141_v2 = vld [vmem:[%s313_s0 + $0x80] sm:$0xff]  ;;  %v26_v3 = vmax.f32 %v9_v0, %v133_v1  ;;  %v34_v4 = vadd.f32 %v133_v1, %v9_v0  ;;  %v27_v8 = vmax.f32 %v10_v5, %v134_v6  ;;  %v35_v9 = vadd.f32 %v134_v6, %v10_v5  ;;  %v142_v10 = vld [vmem:[%s313_s0 + $0x88] sm:$0xff]  ;;  %v143_v16 = vld [vmem:[%s313_s0 + $0x90] sm:$0xff] }
   0x4   :  { %v149_v7 = vld [vmem:[%s313_s0 + $0xc0] sm:$0xff]  ;;  %v150_v14 = vld [vmem:[%s313_s0 + $0xc8] sm:$0xff]  ;;  %v28_v19 = vmax.f32 %v11_v11, %v135_v15  ;;  %v36_v20 = vadd.f32 %v135_v15, %v11_v11  ;;  %v12_v21 = vld [vmem:[%s313_s0 + $0x18] sm:$0xff] }
   0x5   :  { %v51_v12 = vmax.f32 %v26_v3, %v141_v2  ;;  %v59_v13 = vadd.f32 %v141_v2, %v34_v4  ;;  %v52_v17 = vmax.f32 %v27_v8, %v142_v10  ;;  %v60_v18 = vadd.f32 %v142_v10, %v35_v9  ;;  %v136_v22 = vld [vmem:[%s313_s0 + $0x58] sm:$0xff]  ;;  %v151_v26 = vld [vmem:[%s313_s0 + $0xd0] sm:$0xff]  ;;  %v13_v29 = vld [vmem:[%s313_s0 + $0x20] sm:$0xff] }
   0x6   :  { %v144_v23 = vld [vmem:[%s313_s0 + $0x98] sm:$0xff]  ;;  %v29_v27 = vmax.f32 %v12_v21, %v136_v22  ;;  %v37_v28 = vadd.f32 %v136_v22, %v12_v21  ;;  %v137_v30 = vld [vmem:[%s313_s0 + $0x60] sm:$0xff]  ;;  %v53_v33 = vmax.f32 %v28_v19, %v143_v16  ;;  %v61_v34 = vadd.f32 %v143_v16, %v36_v20  ;;  %v14_v45 = vld [vmem:[%s313_s0 + $0x28] sm:$0xff] }
   0x7   :  { %v76_v24 = vmax.f32 %v51_v12, %v149_v7  ;;  %v84_v25 = vadd.f32 %v149_v7, %v59_v13  ;;  %v77_v31 = vmax.f32 %v52_v17, %v150_v14  ;;  %v85_v32 = vadd.f32 %v150_v14, %v60_v18  ;;  %v152_v35 = vld [vmem:[%s313_s0 + $0xd8] sm:$0xff]  ;;  %v145_v40 = vld [vmem:[%s313_s0 + $0xa0] sm:$0xff]  ;;  %v138_v46 = vld [vmem:[%s313_s0 + $0x68] sm:$0xff] }
   0x8   :  { %v54_v37 = vmax.f32 %v29_v27, %v144_v23  ;;  %v62_v38 = vadd.f32 %v144_v23, %v37_v28  ;;  %v30_v39 = vmax.f32 %v13_v29, %v137_v30  ;;  %v78_v42 = vmax.f32 %v53_v33, %v151_v26  ;;  %v153_v51 = vld [vmem:[%s313_s0 + $0xe0] sm:$0xff]  ;;  %v15_v52 = vld [vmem:[%s313_s0 + $0x30] sm:$0xff]  ;;  %v146_v58 = vld [vmem:[%s313_s0 + $0xa8] sm:$0xff] }
   0x9   :  { %v92_v36 = vmul.f32 0.25, %v84_v25  ;;  %v93_v41 = vmul.f32 0.25, %v85_v32  ;;  %v86_v43 = vadd.f32 %v151_v26, %v61_v34  ;;  %v38_v44 = vadd.f32 %v137_v30, %v13_v29  ;;  %v139_v53 = vld [vmem:[%s313_s0 + $0x70] sm:$0xff] }
   0xa   :  { %v79_v48 = vmax.f32 %v54_v37, %v152_v35  ;;  %v87_v49 = vadd.f32 %v152_v35, %v62_v38  ;;  %v55_v50 = vmax.f32 %v30_v39, %v145_v40  ;;  %v31_v57 = vmax.f32 %v14_v45, %v138_v46 }
   0xb   :  { %v100_v47 = vadd.f32 %v92_v36, %v76_v24  ;;  %v101_v54 = vadd.f32 %v93_v41, %v77_v31  ;;  %v94_v55 = vmul.f32 0.25, %v86_v43  ;;  %v63_v56 = vadd.f32 %v145_v40, %v38_v44 }
   0xc   :  { %6 = vsyncpa [#allocation3], 0  ;;  %v95_v59 = vmul.f32 0.25, %v87_v49  ;;  %v80_v60 = vmax.f32 %v55_v50, %v153_v51  ;;  %v39_v61 = vadd.f32 %v138_v46, %v14_v45  ;;  %v32_v62 = vmax.f32 %v15_v52, %v139_v53  ;;  %v147_v63 = vld [vmem:[%s313_s0 + $0xb0] sm:$0xff]  ;;  %v16_v0 = vld [vmem:[%s313_s0 + $0x38] sm:$0xff]  ;;  %s184_s12 = smov [#allocation2]  }
   0xd   :  { %109 = vst.msk [vmem:[#allocation2] sm:$0xff] %vm108_vm0, %v100_v47  ;;  %v140_v1 = vld [vmem:[%s313_s0 + $0x78] sm:$0xff]  ;;  %110 = vst.msk [vmem:[#allocation2 + $0x8] sm:$0xff] %vm108_vm0, %v101_v54  ;;  %v102_v2 = vadd.f32 %v94_v55, %v78_v42  ;;  %v88_v3 = vadd.f32 %v153_v51, %v63_v56  ;;  %v56_v4 = vmax.f32 %v31_v57, %v146_v58  ;;  %v154_v5 = vld [vmem:[%s313_s0 + $0xe8] sm:$0xff]  ;;  %s122_s13 = sshll.u32 %s184_s12, 4  ;;  %s123_s13 = int_to_ptr.vmem [resolvable:$true] %s122_s13 }
   0xe   :  { %v40_v6 = vadd.f32 %v139_v53, %v15_v52  ;;  %v103_v7 = vadd.f32 %v95_v59, %v79_v48  ;;  %v64_v8 = vadd.f32 %v146_v58, %v39_v61  ;;  %v57_v9 = vmax.f32 %v32_v62, %v147_v63  ;;  %v155_v10 = vld [vmem:[%s313_s0 + $0xf0] sm:$0xff]  ;;  %v148_v12 = vld [vmem:[%s313_s0 + $0xb8] sm:$0xff]  ;;  %p165_p1 = scmp.lt.s32.totalorder %s123_s13, %s123_s13 }
   0xf   :  { %v33_v11 = vmax.f32 %v16_v0, %v140_v1  ;;  %111 = vst.msk [vmem:[#allocation2 + $0x10] sm:$0xff] %vm108_vm0, %v102_v2  ;;  %v96_v13 = vmul.f32 0.25, %v88_v3  ;;  %v41_v15 = vadd.f32 %v140_v1, %v16_v0  ;;  %v81_v16 = vmax.f32 %v56_v4, %v154_v5  ;;  %v156_v19 = vld [vmem:[%s313_s0 + $0xf8] sm:$0xff]  ;;  %s160_s0 = scalar_lea.vmem %s123_s13, 1024 }
  0x10   :  { %v65_v14 = vadd.f32 %v147_v63, %v40_v6  ;;  %112 = vst.msk [vmem:[#allocation2 + $0x18] sm:$0xff] %vm108_vm0, %v103_v7  ;;  %v89_v17 = vadd.f32 %v154_v5, %v64_v8  ;;  %v82_v21 = vmax.f32 %v57_v9, %v155_v10  ;;  %p161_p0 = scmp.ne.s32.totalorder %s123_s13, %s160_s0  ;;  %p166_p2 = scmp.lt.s32.totalorder %s160_s0, %s160_s0 }
  0x11   :  { %v58_v18 = vmax.f32 %v33_v11, %v148_v12  ;;  %v104_v20 = vadd.f32 %v96_v13, %v80_v60  ;;  %v66_v23 = vadd.f32 %v148_v12, %v41_v15 }
  0x12   :  { %v90_v22 = vadd.f32 %v155_v10, %v65_v14  ;;  %v97_v24 = vmul.f32 0.25, %v89_v17  ;;  %p167_p3 = por %p166_p2, %p165_p1 }
  0x13   :  { %113 = vst.msk [vmem:[#allocation2 + $0x20] sm:$0xff] %vm108_vm0, %v104_v20  ;;  %v83_v26 = vmax.f32 %v58_v18, %v156_v19  ;;  %v91_v27 = vadd.f32 %v156_v19, %v66_v23 }
  0x14   :  { %v98_v25 = vmul.f32 0.25, %v90_v22  ;;  %v105_v28 = vadd.f32 %v97_v24, %v81_v16  ;;  %p168_p4 = pnand %p167_p3, %p161_p0 }
  0x15   :  { %v99_v30 = vmul.f32 0.25, %v91_v27 }
  0x16   :  { %v106_v29 = vadd.f32 %v98_v25, %v82_v21  ;;  %114 = vst.msk [vmem:[#allocation2 + $0x28] sm:$0xff] %vm108_vm0, %v105_v28 }
  0x17   :  { %v107_v31 = vadd.f32 %v99_v30, %v83_v26 }
  0x18   :  { %115 = vst.msk [vmem:[#allocation2 + $0x30] sm:$0xff] %vm108_vm0, %v106_v29 }
  0x19   :  { %116 = vst.msk [vmem:[#allocation2 + $0x38] sm:$0xff] %vm108_vm0, %v107_v31 }
  0x1a   :  { %171 = shalt.err (!%p168_p4)
}
  0x1b   :  { %s172_s16 = scalar_lea.hbm %s314_s1, 1024 }
  0x1c   :  { %p173_p5 = scmp.ne.s32.totalorder %s314_s1, %s172_s16  ;;  %p176_p6 = scmp.lt.u32.totalorder %s172_s16, %s314_s1 }
  0x1e   :  { %p178_p7 = pnand %p176_p6, %p173_p5 }
  0x20   :  { %181 = shalt.err (!%p178_p7)
}
  0x21   :  { %s185_s21 = smov 128   ;;  %s186_s22 = smov 8  }
  0x22   :  { %128 = dma.vmem_to_hbm [thread:$0]  %s123_s13, 1024, %s314_s1, [#allocation3], %s185_s21, %s185_s21, %s186_s22  }
  0x23   :  { %182 = dma.done.wait [#allocation3], 1024  }
  0x24   :  { %183 = vsyncadd [#allocation3], 4294966272 }
  0x25   :  { %132 = vsyncpa [#allocation3], 1 }

</bundles_post_ra>
